<compile_context>
chip_gen: v7x
topology: tpu7x:2x2x1
jax: 0.10.0
libtpu: 0.0.40
codegen_flags: <defaults>
</compile_context>

<pallas_src>
import jax
import jax.numpy as jnp
from jax.experimental import pallas as pl
from jax.experimental.pallas import tpu as pltpu


# Default tile sizes (bf16-friendly; ~8-12 MiB of VMEM with double buffering).
_TM_DEFAULT = 512
_TN_DEFAULT = 512
_TK_DEFAULT = 1024

# Below this many FLOPs, Pallas launch + pad/slice overhead dominates.
_SMALL_PROBLEM_FLOPS = 2 * 256 * 256 * 256


def _round_up(x: int, m: int) -> int:
    return ((x + m - 1) // m) * m


def _pick_tile(dim: int, default: int, align: int) -> int:
    """Tile size: a multiple of `align`, no larger than needed for tiny dims."""
    return min(default, _round_up(dim, align))


def _lane_align(dim: int) -> int:
    """256-aligned lane tiles for the 2x256x256 MXUs when the dim is big enough."""
    return 256 if dim >= 256 else 128


def _matmul_kernel_acc(x_ref, w_ref, o_ref, acc_ref):
    """One (tm, tn) output tile; accumulates over the K grid axis (axis 2)."""
    k = pl.program_id(2)

    @pl.when(k == 0)
    def _():
        acc_ref[...] = jnp.zeros_like(acc_ref)

    acc_ref[...] += jnp.dot(
        x_ref[...], w_ref[...], preferred_element_type=jnp.float32
    )

    @pl.when(k == pl.num_programs(2) - 1)
    def _():
        o_ref[...] = acc_ref[...].astype(o_ref.dtype)


def _matmul_kernel_single_k(x_ref, w_ref, o_ref):
    """K fits in one tile: no accumulator scratch, no init/finalize RMW."""
    o_ref[...] = jnp.dot(
        x_ref[...], w_ref[...], preferred_element_type=jnp.float32
    ).astype(o_ref.dtype)


def linear_output(
    x: jax.Array,
    weight: jax.Array,
    *,
    operand_dtype=jnp.bfloat16,  # None -> keep original (f32) operands
    tm: int = _TM_DEFAULT,
    tn: int = _TN_DEFAULT,
    tk: int = _TK_DEFAULT,
    use_kernel: bool | None = None,  # None: auto (FLOP threshold)
) -> jax.Array:
    """Computes x @ weight with a tiled Pallas TPU kernel.

    x: [..., d_model], weight: [d_model, d_output] -> [..., d_output]
    """
    d_model, d_output = weight.shape
    lead_shape = x.shape[:-1]
    m = 1
    for s in lead_shape:
        m *= s

    out_dtype = x.dtype
    flops = 2 * m * d_model * d_output

    # Small-problem fast path: plain XLA matmul beats custom-call overhead.
    if use_kernel is None:
        use_kernel = flops >= _SMALL_PROBLEM_FLOPS
    if not use_kernel:
        return x @ weight

    x2d = x.reshape(m, d_model)
    if operand_dtype is not None:
        x2d = x2d.astype(operand_dtype)
        weight = weight.astype(operand_dtype)
    op_bytes = jnp.dtype(x2d.dtype).itemsize
    out_bytes = jnp.dtype(out_dtype).itemsize

    # Adaptive tile sizes. Sublane (M) alignment: 16 for 2-byte operands so
    # bf16 vregs are fully packed; lane (N/K) alignment: 256 for the 256x256
    # MXUs when the dim is big enough, else 128.
    m_align = 16 if op_bytes == 2 else 8
    tm_e = _pick_tile(m, tm, m_align)
    tn_e = _pick_tile(d_output, tn, _lane_align(d_output))
    tk_e = _pick_tile(d_model, tk, _lane_align(d_model))

    m_pad = _round_up(m, tm_e)
    n_pad = _round_up(d_output, tn_e)
    k_pad = _round_up(d_model, tk_e)

    # Keep >= 2 parallel tiles when possible so both v7x TensorCores get work.
    if (m_pad // tm_e) * (n_pad // tn_e) == 1 and n_pad >= 256 and n_pad % 256 == 0:
        tn_e = n_pad // 2

    # Pad only when needed. K-padding is zeros -> exact result; padded M/N
    # rows/cols are sliced off after the call (skipped when no padding).
    if (m_pad, k_pad) != (m, d_model):
        x2d = jnp.pad(x2d, ((0, m_pad - m), (0, k_pad - d_model)))
    w_p = weight
    if (k_pad, n_pad) != (d_model, d_output):
        w_p = jnp.pad(weight, ((0, k_pad - d_model), (0, n_pad - d_output)))

    k_steps = k_pad // tk_e
    cost = pl.CostEstimate(
        flops=flops,
        transcendentals=0,
        bytes_accessed=(
            m * d_model * op_bytes
            + d_model * d_output * op_bytes
            + m * d_output * out_bytes
        ),
    )

    if k_steps == 1:
        # K fits in one tile: 2-D grid, x tile invariant across the N loop
        # (its DMA is skipped), no accumulator readback.
        grid = (m_pad // tm_e, n_pad // tn_e)
        vmem_est = 2 * (tm_e * k_pad + k_pad * tn_e) * op_bytes + 2 * tm_e * tn_e * out_bytes
        vmem_limit = int(min(max(2 * vmem_est, 32 << 20), 64 << 20))
        out_p = pl.pallas_call(
            _matmul_kernel_single_k,
            out_shape=jax.ShapeDtypeStruct((m_pad, n_pad), out_dtype),
            grid_spec=pltpu.PrefetchScalarGridSpec(
                num_scalar_prefetch=0,
                grid=grid,
                in_specs=[
                    pl.BlockSpec((tm_e, k_pad), lambda i, j: (i, 0)),
                    pl.BlockSpec((k_pad, tn_e), lambda i, j: (0, j)),
                ],
                out_specs=pl.BlockSpec((tm_e, tn_e), lambda i, j: (i, j)),
            ),
            compiler_params=pltpu.CompilerParams(
                dimension_semantics=("parallel", "parallel"),
                vmem_limit_bytes=vmem_limit,
            ),
            cost_estimate=cost,
        )(x2d, w_p)
    else:
        grid = (m_pad // tm_e, n_pad // tn_e, k_steps)
        vmem_est = (
            2 * (tm_e * tk_e + tk_e * tn_e) * op_bytes
            + 2 * tm_e * tn_e * out_bytes
            + tm_e * tn_e * 4
        )
        vmem_limit = int(min(max(2 * vmem_est, 32 << 20), 64 << 20))
        out_p = pl.pallas_call(
            _matmul_kernel_acc,
            out_shape=jax.ShapeDtypeStruct((m_pad, n_pad), out_dtype),
            grid_spec=pltpu.PrefetchScalarGridSpec(
                num_scalar_prefetch=0,
                grid=grid,
                in_specs=[
                    # x tile depends on (i, k); invariant in j -> reused across N.
                    pl.BlockSpec((tm_e, tk_e), lambda i, j, k: (i, k)),
                    # weight tile depends on (k, j); invariant in i -> reused across M.
                    pl.BlockSpec((tk_e, tn_e), lambda i, j, k: (k, j)),
                ],
                out_specs=pl.BlockSpec((tm_e, tn_e), lambda i, j, k: (i, j)),
                scratch_shapes=[pltpu.VMEM((tm_e, tn_e), jnp.float32)],
            ),
            compiler_params=pltpu.CompilerParams(
                dimension_semantics=("parallel", "parallel", "arbitrary"),
                vmem_limit_bytes=vmem_limit,
            ),
            cost_estimate=cost,
        )(x2d, w_p)

    out = out_p
    if (m_pad, n_pad) != (m, d_output):
        out = out_p[:m, :d_output]
    return out.reshape(*lead_shape, d_output)


if __name__ == "__main__":
    key = jax.random.PRNGKey(0)
    k_x, k_w = jax.random.split(key)

    batch, seq, d_model, d_output = 2, 8, 32, 16

    # Deterministic inputs / params (torch.rand -> uniform [0, 1) for weight).
    x = jax.random.normal(k_x, (batch, seq, d_model), dtype=jnp.float32)
    weight = jax.random.uniform(k_w, (d_model, d_output), dtype=jnp.float32)

    ref = x @ weight

    # f32 operand path: bit-tight check (forced onto the kernel despite the
    # tiny shape, so the Pallas path is actually exercised).
    out_f32 = jax.block_until_ready(
        linear_output(x, weight, operand_dtype=None, use_kernel=True)
    )
    assert out_f32.shape == (batch, seq, d_output)
    assert jnp.allclose(out_f32, ref, atol=1e-5, rtol=1e-5)

    # Default bf16 operand path (f32 accumulation): loose tolerance.
    out_bf16 = jax.block_until_ready(linear_output(x, weight, use_kernel=True))
    assert out_bf16.shape == (batch, seq, d_output)
    assert jnp.allclose(out_bf16, ref, atol=2e-2, rtol=2e-2)

    print("KERNEL_OK")
</pallas_src>

<mosaic_0001>
module attributes {stable_mosaic.version = 11 : i64} {
  func.func @_matmul_kernel_single_k(%arg0: i32, %arg1: i32, %arg2: memref<16x128xf32, #tpu.memory_space<vmem>>, %arg3: memref<128x128xf32, #tpu.memory_space<vmem>>, %arg4: memref<16x128xf32, #tpu.memory_space<vmem>>) attributes {dimension_semantics = [#tpu.dimension_semantics<parallel>, #tpu.dimension_semantics<parallel>], iteration_bounds = array<i64: 1, 1>, scalar_prefetch = 0 : i64, scratch_operands = 0 : i64, tpu.core_type = #tpu.core_type<tc>, window_params = [{transform_indices = @transform_0, window_bounds = array<i64: 16, 128>}, {transform_indices = @transform_1, window_bounds = array<i64: 128, 128>}, {transform_indices = @transform_2, window_bounds = array<i64: 16, 128>}]} {
    %c0 = arith.constant 0 : index
    %c0_0 = arith.constant 0 : index
    %0 = vector.load %arg2[%c0, %c0_0] : memref<16x128xf32, #tpu.memory_space<vmem>>, vector<16x128xf32>
    %c0_1 = arith.constant 0 : index
    %c0_2 = arith.constant 0 : index
    %1 = vector.load %arg3[%c0_1, %c0_2] : memref<128x128xf32, #tpu.memory_space<vmem>>, vector<128x128xf32>
    %cst = arith.constant dense<0.000000e+00> : vector<16x128xf32>
    %2 = tpu.matmul %0, %1, %cst {dimension_numbers = #tpu.dot_dimension_numbers<[1], [0], [0], [1], [0, 0, 1, 1], [], []>} : vector<16x128xf32>, vector<128x128xf32>, vector<16x128xf32> -> vector<16x128xf32>
    %c0_3 = arith.constant 0 : index
    %c0_4 = arith.constant 0 : index
    %3 = vector.load %arg4[%c0_3, %c0_4] : memref<16x128xf32, #tpu.memory_space<vmem>>, vector<16x128xf32>
    tpu.vector_store %arg4[%c0_3, %c0_4], %2 {strides = array<i32>} : memref<16x128xf32, #tpu.memory_space<vmem>>, vector<16x128xf32>,
    return
  }
  func.func @transform_0(%arg0: i32, %arg1: i32) -> (i32, i32) {
    %c0_i32 = arith.constant 0 : i32
    %c0_i32_0 = arith.constant 0 : i32
    return %arg0, %c0_i32 : i32, i32
  }
  func.func @transform_1(%arg0: i32, %arg1: i32) -> (i32, i32) {
    %c0_i32 = arith.constant 0 : i32
    %c0_i32_0 = arith.constant 0 : i32
    return %c0_i32, %arg1 : i32, i32
  }
  func.func @transform_2(%arg0: i32, %arg1: i32) -> (i32, i32) {
    %c0_i32 = arith.constant 0 : i32
    return %arg0, %arg1 : i32, i32
  }
}

</mosaic_0001>

<bundles_post_ra>
// kernel: tpu_custom_call.1
= control target key start
LH: loop header
LB: loop body
LE: loop exit
PB: predicated region body
PF: predicated region fallthrough
CT: control target
= control target key end

     0   :  { %7 = vsyncpa [#allocation3], 0  ;;  %s380_s0 = inlined_call_operand.hbm [shape: f32[16,128], index: 0, kind: input, shape index: {}]   ;;  %s381_s1 = inlined_call_operand.hbm [shape: f32[128,128], index: 1, kind: input, shape index: {}]   ;;  %s382_s2 = inlined_call_operand.hbm [shape: f32[16,128], index: 2, kind: output, shape index: {}]  }
   0x1   :  { %8 = vsyncpa [#allocation6], 0 }
   0x2   :  { %9 = vsyncpa [#allocation4], 0  ;;  %s315_s9 = smov [#allocation2]   ;;  %s243_s13 = scalar_lea.hbm %s380_s0, 256 }
   0x3   :  { %s15_s10 = sshll.u32 %s315_s9, 4  ;;  %p244_p0 = scmp.ne.s32.totalorder %s380_s0, %s243_s13  ;;  %s16_s10 = int_to_ptr.vmem [resolvable:$true] %s15_s10 }
   0x4   :  { %p247_p1 = scmp.lt.u32.totalorder %s243_s13, %s380_s0 }
   0x6   :  { %p249_p2 = pnand %p247_p1, %p244_p0 }
   0x8   :  { %252 = shalt.err (!%p249_p2)
}
   0x9   :  { %s253_s18 = scalar_lea.vmem %s16_s10, 256  ;;  %p258_p4 = scmp.lt.s32.totalorder %s16_s10, %s16_s10 }
   0xa   :  { %p254_p3 = scmp.ne.s32.totalorder %s16_s10, %s253_s18  ;;  %p259_p5 = scmp.lt.s32.totalorder %s253_s18, %s253_s18 }
   0xc   :  { %p260_p6 = por %p259_p5, %p258_p4 }
   0xe   :  { %p261_p7 = pnand %p260_p6, %p254_p3 }
  0x10   :  { %264 = shalt.err (!%p261_p7)
}
  0x11   :  { %s316_s19 = smov 128   ;;  %s317_s20 = smov 8  }
  0x12   :  { %21 = dma.hbm_to_vmem [thread:$0]  %s380_s0, 256, %s16_s10, [#allocation3], %s316_s19, %s316_s19, %s317_s20  }
  0x13   :  { %s318_s23 = smov [#allocation5]   ;;  %s265_s27 = scalar_lea.hbm %s381_s1, 2048 }
  0x14   :  { %s27_s24 = sshll.u32 %s318_s23, 4  ;;  %p266_p8 = scmp.ne.s32.totalorder %s381_s1, %s265_s27  ;;  %s28_s24 = int_to_ptr.vmem [resolvable:$true] %s27_s24 }
  0x15   :  { %p269_p9 = scmp.lt.u32.totalorder %s265_s27, %s381_s1 }
  0x17   :  { %p271_p10 = pnand %p269_p9, %p266_p8 }
  0x19   :  { %274 = shalt.err (!%p271_p10)
}
  0x1a   :  { %s275_s4 = scalar_lea.vmem %s28_s24, 2048  ;;  %p280_p12 = scmp.lt.s32.totalorder %s28_s24, %s28_s24 }
  0x1b   :  { %p276_p11 = scmp.ne.s32.totalorder %s28_s24, %s275_s4  ;;  %p281_p13 = scmp.lt.s32.totalorder %s275_s4, %s275_s4 }
  0x1d   :  { %p282_p0 = por %p281_p13, %p280_p12 }
  0x1f   :  { %p283_p1 = pnand %p282_p0, %p276_p11 }
  0x21   :  { %286 = shalt.err (!%p283_p1)
}
  0x22   :  { %33 = dma.hbm_to_vmem [thread:$0]  %s381_s1, 2048, %s28_s24, [#allocation6], %s316_s19, %s316_s19, %s317_s20  }
  0x23   :  { %309 = dma.done.wait [#allocation3], 256  }
  0x24   :  { %310 = vsyncadd [#allocation3], 4294967040 }
  0x25   :  { %311 = dma.done.wait [#allocation6], 2048  }
  0x26   :  { %312 = vsyncadd [#allocation6], 4294965248  ;;  %v42_v0 = vld [vmem:[#allocation5] sm:$0xff]  ;;  %v43_v1 = vld [vmem:[#allocation5 + $0x8] sm:$0xff]  ;;  %s319_s1 = smov [#allocation7]  }
  0x27   :  { %v44_v2 = vld [vmem:[#allocation5 + $0x10] sm:$0xff]  ;;  %v206_v3 = vpack.c.bf16 %v43_v1, %v42_v0  ;;  %v45_v4 = vld [vmem:[#allocation5 + $0x18] sm:$0xff]  ;;  %v46_v6 = vld [vmem:[#allocation5 + $0x20] sm:$0xff]  ;;  %s140_s6 = sshll.u32 %s319_s1, 4  ;;  %s141_s6 = int_to_ptr.vmem [resolvable:$true] %s140_s6 }
  0x28   :  { %v210_v5 = vpack.c.bf16 %v45_v4, %v44_v2  ;;  %v47_v7 = vld [vmem:[#allocation5 + $0x28] sm:$0xff]  ;;  %v40_v9 = vld [vmem:[#allocation2] sm:$0xff]  ;;  %v49_v11 = vld [vmem:[#allocation5 + $0x38] sm:$0xff]  ;;  %s287_s7 = scalar_lea.vmem %s141_s6, 256  ;;  %p292_p3 = scmp.lt.s32.totalorder %s141_s6, %s141_s6 }
  0x29   :  { %207 = vmatprep.subr.bf16.mxu0 %v206_v3  ;;  %v214_v8 = vpack.c.bf16 %v47_v7, %v46_v6  ;;  %v48_v10 = vld [vmem:[#allocation5 + $0x30] sm:$0xff]  ;;  %203 = vmatprep.mubr.f32.mxu0 %v40_v9  ;;  %v50_v13 = vld [vmem:[#allocation5 + $0x40] sm:$0xff]  ;;  %v51_v14 = vld [vmem:[#allocation5 + $0x48] sm:$0xff]  ;;  %p288_p2 = scmp.ne.s32.totalorder %s141_s6, %s287_s7  ;;  %p293_p4 = scmp.lt.s32.totalorder %s287_s7, %s287_s7 }
  0x2a   :  { %209 = vmatpush3.bf16.msra.mxu0 %v206_v3  ;;  %v218_v12 = vpack.c.bf16 %v49_v11, %v48_v10  ;;  %v222_v15 = vpack.c.bf16 %v51_v14, %v50_v13  ;;  %v52_v16 = vld [vmem:[#allocation5 + $0x50] sm:$0xff]  ;;  %v53_v17 = vld [vmem:[#allocation5 + $0x58] sm:$0xff]  ;;  %v54_v19 = vld [vmem:[#allocation5 + $0x60] sm:$0xff] }
  0x2b   :  { %211 = vmatprep.subr.bf16.mxu0 %v210_v5  ;;  %v226_v18 = vpack.c.bf16 %v53_v17, %v52_v16  ;;  %v55_v20 = vld [vmem:[#allocation5 + $0x68] sm:$0xff]  ;;  %v56_v22 = vld [vmem:[#allocation5 + $0x70] sm:$0xff]  ;;  %v57_v23 = vld [vmem:[#allocation5 + $0x78] sm:$0xff]  ;;  %p294_p5 = por %p293_p4, %p292_p3 }
  0x2c   :  { %v230_v21 = vpack.c.bf16 %v55_v20, %v54_v19  ;;  %v234_v24 = vpack.c.bf16 %v57_v23, %v56_v22  ;;  %v41_v25 = vld [vmem:[#allocation2 + $0x8] sm:$0xff] }
  0x2d   :  { %p295_p6 = pnand %p294_p5, %p288_p2 }
  0x2e   :  { %213 = vmatpush3.bf16.msra.mxu0 %v210_v5 }
  0x2f   :  { %215 = vmatprep.subr.bf16.mxu0 %v214_v8 }
  0x32   :  { %217 = vmatpush3.bf16.msra.mxu0 %v214_v8 }
  0x33   :  { %219 = vmatprep.subr.bf16.mxu0 %v218_v12 }
  0x36   :  { %221 = vmatpush3.bf16.msra.mxu0 %v218_v12 }
  0x37   :  { %223 = vmatprep.subr.bf16.mxu0 %v222_v15 }
  0x3a   :  { %225 = vmatpush3.bf16.msra.mxu0 %v222_v15 }
  0x3b   :  { %227 = vmatprep.subr.bf16.mxu0 %v226_v18 }
  0x3e   :  { %229 = vmatpush3.bf16.msra.mxu0 %v226_v18 }
  0x3f   :  { %231 = vmatprep.subr.bf16.mxu0 %v230_v21 }
  0x42   :  { %233 = vmatpush3.bf16.msra.mxu0 %v230_v21 }
  0x43   :  { %235 = vmatprep.subr.bf16.mxu0 %v234_v24 }
  0x46   :  { %237 = vmatpush3.bf16.msra.mxu0 %v234_v24 }
  0x49   :  { %204 = vmatmul.mubr.f32.vlgmr.msra.gmra.mrb[0].mxu0 %v41_v25 }
 0x11c   :  { %v205_v26 = vpop.f32.mrb[0].mxu0 }
 0x11d   :  { %134 = vst [vmem:[#allocation7 + $0x8] sm:$0xff] %v205_v26  ;;  %v124_v27 = vpop.f32.mrb[1].mxu0 }
 0x11e   :  { %133 = vst [vmem:[#allocation7] sm:$0xff] %v124_v27 }
 0x11f   :  { %298 = shalt.err (!%p295_p6)
}
 0x120   :  { %s299_s10 = scalar_lea.hbm %s382_s2, 256 }
 0x121   :  { %p300_p7 = scmp.ne.s32.totalorder %s382_s2, %s299_s10  ;;  %p303_p8 = scmp.lt.u32.totalorder %s299_s10, %s382_s2 }
 0x123   :  { %p305_p9 = pnand %p303_p8, %p300_p7 }
 0x125   :  { %308 = shalt.err (!%p305_p9)
}
 0x126   :  { %146 = dma.vmem_to_hbm [thread:$0]  %s141_s6, 256, %s382_s2, [#allocation4], %s316_s19, %s316_s19, %s317_s20  }
 0x127   :  { %313 = dma.done.wait [#allocation4], 256  }
 0x128   :  { %314 = vsyncadd [#allocation4], 4294967040 }
 0x129   :  { %150 = vsyncpa [#allocation3], 1 }
 0x12a   :  { %151 = vsyncpa [#allocation6], 1 }
 0x12b   :  { %152 = vsyncpa [#allocation4], 1 }

</bundles_post_ra>
